<compile_context>
chip_gen: v7x
topology: tpu7x:2x2x1
jax: 0.10.0
libtpu: 0.0.40
codegen_flags: <defaults>
</compile_context>

<pallas_src>
import jax
import jax.numpy as jnp
from jax.experimental import pallas as pl
from jax.experimental.pallas import tpu as pltpu

LN_EPS = 1e-5
LANES = 128


def hidden_layer_kernel(x_ref, w_ref, a_ref, b_ref, o_ref):
    # x_ref: (tmd, 128) f32   lane-dense packed rows (P logical rows / dense row)
    # w_ref: (128, 128) bf16  block-diag replicated (masked weight)^T
    # a_ref: (128, 128) bf16  block-diag per-32-lane averaging matrix (1/32)
    # b_ref: (1, 128)   f32   bias tiled P times
    # o_ref: (tmd, 128)       lane-dense packed output rows
    tmd = x_ref.shape[0]

    # 1+2) masked Linear: bf16 operands, f32 accumulation.
    x_bf = x_ref[...].astype(jnp.bfloat16)
    y = jnp.dot(x_bf, w_ref[...], preferred_element_type=jnp.float32)
    y = jnp.tanh(y + b_ref[...])                         # 3) activation (EUP)

    # 4) dropout with p=0.0 in eval mode -> identity
    # TODO(synk): training-mode dropout (p>0) would need pltpu.prng_* masking.

    # 5) LayerNorm per 32-lane segment (no affine). Both moments come from a
    #    single stacked bf16 matmul against the resident averaging matrix
    #    (one RHS push, no serial mean->var chain); var = E[y^2] - mean^2 in
    #    f32, clamped at 0 to guard against bf16 rounding in degenerate
    #    near-constant segments.
    y_bf = y.astype(jnp.bfloat16)
    stacked = jnp.concatenate([y_bf, y_bf * y_bf], axis=0)           # (2*tmd,128)
    mom = jnp.dot(stacked, a_ref[...], preferred_element_type=jnp.float32)
    mean = mom[:tmd]
    var = jnp.maximum(mom[tmd:] - mean * mean, 0.0)
    o_ref[...] = ((y - mean) * jax.lax.rsqrt(var + LN_EPS)).astype(o_ref.dtype)


def hidden_layer_forward(x, weight, group_mask, bias, *, tm_max=8192, out_dtype=None):
    """x: (B, T, F_in) -> (B, T, F_out). Fused masked-Linear + tanh + LayerNorm."""
    B, T, K = x.shape
    N = weight.shape[0]
    assert K == N and LANES % N == 0, (
        "lane-dense packed path implemented for in_features == out_features "
        "dividing 128 (module config is 32/32)")
    P = LANES // N                       # logical rows packed per 128-lane dense row
    M = B * T
    out_dtype = x.dtype if out_dtype is None else out_dtype

    # ---- layout plumbing (no full-array pad copy in the common case) ----
    x2d = x.reshape(M, K)
    Mp = pl.cdiv(M, P) * P               # lane-pack reshape needs a multiple of P rows
    if Mp != M:                          # rare (M % 4 != 0): at most P-1 pad rows
        x2d = jnp.pad(x2d, ((0, Mp - M), (0, 0)))
    Md = Mp // P
    x_dense = x2d.reshape(Md, LANES)     # row-major contiguous: metadata-only reshape
    Md_pad = max(Md, 16)                 # tiny inputs: guarantee one full (16,128) block
    if Md_pad != Md:
        x_dense = jnp.pad(x_dense, ((0, Md_pad - Md), (0, 0)))

    # ---- dense-row tile: large (amortize per-step overhead), 16-aligned, and
    #      sized so there are >= 2 grid steps when possible (megacore on v7x).
    #      Partial last block is handled by Pallas (masked stores; LN per-row).
    tmd_cap = max(16, (tm_max // P) // 16 * 16)
    tmd = min(tmd_cap, max(16, pl.cdiv(pl.cdiv(Md_pad, 2), 16) * 16))
    n_steps = pl.cdiv(Md_pad, tmd)

    # ---- one-time parameter prep (hoisted mask/transpose/replication; bf16 RHS) ----
    wt = (weight * group_mask).T                                     # (K, N)
    w_big = jnp.kron(jnp.eye(P, dtype=wt.dtype), wt).astype(jnp.bfloat16)
    a_seg = jnp.kron(jnp.eye(P, dtype=wt.dtype),
                     jnp.full((N, N), 1.0 / N, dtype=wt.dtype)).astype(jnp.bfloat16)
    b_dense = jnp.tile(bias, P).reshape(1, LANES)                    # (1, 128) f32

    out_dense = pl.pallas_call(
        hidden_layer_kernel,
        out_shape=jax.ShapeDtypeStruct((Md_pad, LANES), out_dtype),
        grid=(n_steps,),
        in_specs=[
            pl.BlockSpec((tmd, LANES), lambda i: (i, 0)),      # x tile (pipelined)
            pl.BlockSpec((LANES, LANES), lambda i: (0, 0)),    # W_big (resident)
            pl.BlockSpec((LANES, LANES), lambda i: (0, 0)),    # A     (resident)
            pl.BlockSpec((1, LANES), lambda i: (0, 0)),        # bias  (resident)
        ],
        out_specs=pl.BlockSpec((tmd, LANES), lambda i: (i, 0)),
        compiler_params=pltpu.CompilerParams(
            dimension_semantics=("parallel",)),                # megacore on v7x
    )(x_dense, w_big, a_seg, b_dense)

    out2d = out_dense.reshape(Md_pad * P, N)[:M]
    return out2d.reshape(B, T, N)


def make_group_mask(out_features, in_features, groups, dtype=jnp.float32):
    """Reproduce HiddenLayer.__init__ block-diagonal group mask."""
    row_size = out_features // groups
    col_size = in_features // groups
    row_sizes = [row_size] * groups
    col_sizes = [col_size] * groups
    if sum(row_sizes) < out_features:
        row_sizes[-1] += out_features - sum(row_sizes)
    if sum(col_sizes) < in_features:
        col_sizes[-1] += in_features - sum(col_sizes)
    mask = jnp.zeros((out_features, in_features), dtype=dtype)
    i, j = 0, 0
    for rs, cs in zip(row_sizes, col_sizes):
        mask = mask.at[i:i + rs, j:j + cs].set(1.0)
        i += rs
        j += cs
    return mask


def reference_forward(x, weight, group_mask, bias):
    """Pure-JAX f32 reference mirroring the PyTorch forward."""
    w = weight * group_mask
    y = jnp.einsum("btk,nk->btn", x, w) + bias
    y = jnp.tanh(y)
    mean = jnp.mean(y, axis=-1, keepdims=True)
    var = jnp.mean((y - mean) ** 2, axis=-1, keepdims=True)
    return (y - mean) / jnp.sqrt(var + LN_EPS)


def _check(out, ref, tag):
    max_err = float(jnp.max(jnp.abs(out - ref)))
    mean_err = float(jnp.mean(jnp.abs(out - ref)))
    # bf16 MXU operands -> ~1e-3..1e-2 absolute error on O(1) LayerNorm outputs.
    assert max_err < 1e-1 and mean_err < 1e-2, (
        f"{tag}: max_err={max_err:.3e} mean_err={mean_err:.3e}")


if __name__ == "__main__":
    # Module config
    in_features = 32
    out_features = 32
    groups = 2

    key = jax.random.PRNGKey(0)
    kx, kw, kb, kx2 = jax.random.split(key, 4)

    # Deterministic parameter init matching torch.nn.Linear's U(-1/sqrt(K), 1/sqrt(K))
    bound = 1.0 / (in_features ** 0.5)
    weight = jax.random.uniform(
        kw, (out_features, in_features), dtype=jnp.float32,
        minval=-bound, maxval=bound)
    bias = jax.random.uniform(
        kb, (out_features,), dtype=jnp.float32, minval=-bound, maxval=bound)
    group_mask = make_group_mask(out_features, in_features, groups)

    # Small deterministic input: batch=2, seq=8, hidden=32 (single grid step)
    B, T = 2, 8
    x = jax.random.normal(kx, (B, T, in_features), dtype=jnp.float32)
    out = jax.block_until_ready(hidden_layer_forward(x, weight, group_mask, bias))
    ref = reference_forward(x, weight, group_mask, bias)
    assert out.shape == (B, T, out_features)
    _check(out, ref, "small-case")

    # Larger case exercising the M grid and a partial last block (M=4000, 2 steps)
    B2, T2 = 4, 1000
    x2 = jax.random.normal(kx2, (B2, T2, in_features), dtype=jnp.float32)
    out2 = jax.block_until_ready(hidden_layer_forward(x2, weight, group_mask, bias))
    ref2 = reference_forward(x2, weight, group_mask, bias)
    assert out2.shape == (B2, T2, out_features)
    _check(out2, ref2, "gridded-case")

    print("KERNEL_OK")
</pallas_src>

<mosaic_0001>
module attributes {stable_mosaic.version = 11 : i64} {
  func.func @hidden_layer_kernel(%arg0: i32, %arg1: memref<16x128xf32, #tpu.memory_space<vmem>>, %arg2: memref<128x128xbf16, #tpu.memory_space<vmem>>, %arg3: memref<128x128xbf16, #tpu.memory_space<vmem>>, %arg4: memref<1x128xf32, #tpu.memory_space<vmem>>, %arg5: memref<16x128xf32, #tpu.memory_space<vmem>>) attributes {dimension_semantics = [#tpu.dimension_semantics<parallel>], iteration_bounds = array<i64: 1>, scalar_prefetch = 0 : i64, scratch_operands = 0 : i64, tpu.core_type = #tpu.core_type<tc>, window_params = [{transform_indices = @transform_0, window_bounds = array<i64: 16, 128>}, {pipeline_mode = #tpu.pipeline_mode<synchronous>, transform_indices = @transform_1, window_bounds = array<i64: 128, 128>}, {pipeline_mode = #tpu.pipeline_mode<synchronous>, transform_indices = @transform_2, window_bounds = array<i64: 128, 128>}, {pipeline_mode = #tpu.pipeline_mode<synchronous>, transform_indices = @transform_3, window_bounds = array<i64: 1, 128>}, {transform_indices = @transform_4, window_bounds = array<i64: 16, 128>}]} {
    %c0 = arith.constant 0 : index
    %c0_0 = arith.constant 0 : index
    %0 = vector.load %arg1[%c0, %c0_0] : memref<16x128xf32, #tpu.memory_space<vmem>>, vector<16x128xf32>
    %1 = arith.truncf %0 : vector<16x128xf32> to vector<16x128xbf16>
    %c0_1 = arith.constant 0 : index
    %c0_2 = arith.constant 0 : index
    %2 = vector.load %arg2[%c0_1, %c0_2] : memref<128x128xbf16, #tpu.memory_space<vmem>>, vector<128x128xbf16>
    %cst = arith.constant dense<0.000000e+00> : vector<16x128xf32>
    %3 = tpu.matmul %1, %2, %cst {dimension_numbers = #tpu.dot_dimension_numbers<[1], [0], [0], [1], [0, 0, 1, 1], [], []>} : vector<16x128xbf16>, vector<128x128xbf16>, vector<16x128xf32> -> vector<16x128xf32>
    %c0_3 = arith.constant 0 : index
    %c0_4 = arith.constant 0 : index
    %4 = vector.load %arg4[%c0_3, %c0_4] : memref<1x128xf32, #tpu.memory_space<vmem>>, vector<1x128xf32>
    %5 = vector.broadcast %4 : vector<1x128xf32> to vector<16x128xf32>
    %6 = arith.addf %3, %5 : vector<16x128xf32>
    %7 = math.tanh %6 : vector<16x128xf32>
    %8 = arith.truncf %7 : vector<16x128xf32> to vector<16x128xbf16>
    %9 = arith.mulf %8, %8 : vector<16x128xbf16>
    %10 = tpu.concatenate %8, %9 in 0 : vector<16x128xbf16>, vector<16x128xbf16> -> vector<32x128xbf16>
    %c0_5 = arith.constant 0 : index
    %c0_6 = arith.constant 0 : index
    %11 = vector.load %arg3[%c0_5, %c0_6] : memref<128x128xbf16, #tpu.memory_space<vmem>>, vector<128x128xbf16>
    %cst_7 = arith.constant dense<0.000000e+00> : vector<32x128xf32>
    %12 = tpu.matmul %10, %11, %cst_7 {dimension_numbers = #tpu.dot_dimension_numbers<[1], [0], [0], [1], [0, 0, 1, 1], [], []>} : vector<32x128xbf16>, vector<128x128xbf16>, vector<32x128xf32> -> vector<32x128xf32>
    %13 = vector.extract_strided_slice %12 {offsets = [0, 0], sizes = [16, 128], strides = [1, 1]} : vector<32x128xf32> to vector<16x128xf32>
    %14 = vector.extract_strided_slice %12 {offsets = [16, 0], sizes = [16, 128], strides = [1, 1]} : vector<32x128xf32> to vector<16x128xf32>
    %15 = arith.mulf %13, %13 : vector<16x128xf32>
    %16 = arith.subf %14, %15 : vector<16x128xf32>
    %cst_8 = arith.constant 0.000000e+00 : f32
    %17 = vector.broadcast %cst_8 : f32 to vector<16x128xf32>
    %18 = arith.maximumf %16, %17 : vector<16x128xf32>
    %19 = arith.subf %7, %13 : vector<16x128xf32>
    %cst_9 = arith.constant 9.99999974E-6 : f32
    %20 = vector.broadcast %cst_9 : f32 to vector<16x128xf32>
    %21 = arith.addf %18, %20 : vector<16x128xf32>
    %22 = math.rsqrt %21 : vector<16x128xf32>
    %23 = arith.mulf %19, %22 : vector<16x128xf32>
    %c0_10 = arith.constant 0 : index
    %c0_11 = arith.constant 0 : index
    %24 = vector.load %arg5[%c0_10, %c0_11] : memref<16x128xf32, #tpu.memory_space<vmem>>, vector<16x128xf32>
    tpu.vector_store %arg5[%c0_10, %c0_11], %23 {strides = array<i32>} : memref<16x128xf32, #tpu.memory_space<vmem>>, vector<16x128xf32>,
    return
  }
  func.func @transform_0(%arg0: i32) -> (i32, i32) {
    %c0_i32 = arith.constant 0 : i32
    %c0_i32_0 = arith.constant 0 : i32
    return %arg0, %c0_i32 : i32, i32
  }
  func.func @transform_1(%arg0: i32) -> (i32, i32) {
    %c0_i32 = arith.constant 0 : i32
    %c0_i32_0 = arith.constant 0 : i32
    %c0_i32_1 = arith.constant 0 : i32
    return %c0_i32, %c0_i32_0 : i32, i32
  }
  func.func @transform_2(%arg0: i32) -> (i32, i32) {
    %c0_i32 = arith.constant 0 : i32
    %c0_i32_0 = arith.constant 0 : i32
    %c0_i32_1 = arith.constant 0 : i32
    return %c0_i32, %c0_i32_0 : i32, i32
  }
  func.func @transform_3(%arg0: i32) -> (i32, i32) {
    %c0_i32 = arith.constant 0 : i32
    %c0_i32_0 = arith.constant 0 : i32
    %c0_i32_1 = arith.constant 0 : i32
    return %c0_i32, %c0_i32_0 : i32, i32
  }
  func.func @transform_4(%arg0: i32) -> (i32, i32) {
    %c0_i32 = arith.constant 0 : i32
    %c0_i32_0 = arith.constant 0 : i32
    return %arg0, %c0_i32 : i32, i32
  }
}

</mosaic_0001>

<bundles_post_ra>
// kernel: tpu_custom_call.1
= control target key start
LH: loop header
LB: loop body
LE: loop exit
PB: predicated region body
PF: predicated region fallthrough
CT: control target
= control target key end

     0   :  { %9 = vsyncpa [#allocation3], 0  ;;  %s628_s0 = inlined_call_operand.hbm [shape: f32[16,128], index: 0, kind: input, shape index: {}]   ;;  %s629_s1 = inlined_call_operand.hbm [shape: bf16[128,128], index: 1, kind: input, shape index: {}]   ;;  %s630_s2 = inlined_call_operand.hbm [shape: bf16[128,128], index: 2, kind: input, shape index: {}]   ;;  %s631_s3 = inlined_call_operand.vmem [shape: f32[1,128], index: 3, kind: input, shape index: {}]   ;;  %s632_s4 = inlined_call_operand.hbm [shape: f32[16,128], index: 4, kind: output, shape index: {}]  }
   0x1   :  { %10 = vsyncpa [#allocation6], 0 }
   0x2   :  { %11 = vsyncpa [#allocation4], 0  ;;  %s530_s15 = smov [#allocation5]   ;;  %s436_s19 = scalar_lea.hbm %s629_s1, 1024 }
   0x3   :  { %s29_s16 = sshll.u32 %s530_s15, 4  ;;  %p437_p0 = scmp.ne.s32.totalorder %s629_s1, %s436_s19  ;;  %s30_s16 = int_to_ptr.vmem [resolvable:$true] %s29_s16 }
   0x4   :  { %p440_p1 = scmp.lt.u32.totalorder %s436_s19, %s629_s1 }
   0x6   :  { %p442_p2 = pnand %p440_p1, %p437_p0 }
   0x8   :  { %445 = shalt.err (!%p442_p2)
}
   0x9   :  { %s446_s24 = scalar_lea.vmem %s30_s16, 1024  ;;  %p451_p4 = scmp.lt.s32.totalorder %s30_s16, %s30_s16 }
   0xa   :  { %p447_p3 = scmp.ne.s32.totalorder %s30_s16, %s446_s24  ;;  %p452_p5 = scmp.lt.s32.totalorder %s446_s24, %s446_s24 }
   0xc   :  { %p453_p6 = por %p452_p5, %p451_p4 }
   0xe   :  { %p454_p7 = pnand %p453_p6, %p447_p3 }
  0x10   :  { %457 = shalt.err (!%p454_p7)
}
  0x11   :  { %s531_s25 = smov 64   ;;  %s532_s26 = smov 4  }
  0x12   :  { %35 = dma.hbm_to_vmem [thread:$0]  %s629_s1, 1024, %s30_s16, [#allocation6], %s531_s25, %s531_s25, %s532_s26  }
  0x13   :  { %s533_s29 = smov [#allocation2]   ;;  %s458_s7 = scalar_lea.hbm %s628_s0, 256 }
  0x14   :  { %s17_s30 = sshll.u32 %s533_s29, 4  ;;  %p459_p8 = scmp.ne.s32.totalorder %s628_s0, %s458_s7  ;;  %s18_s30 = int_to_ptr.vmem [resolvable:$true] %s17_s30 }
  0x15   :  { %p462_p9 = scmp.lt.u32.totalorder %s458_s7, %s628_s0 }
  0x17   :  { %p464_p10 = pnand %p462_p9, %p459_p8 }
  0x19   :  { %467 = shalt.err (!%p464_p10)
}
  0x1a   :  { %s468_s12 = scalar_lea.vmem %s18_s30, 256  ;;  %p473_p12 = scmp.lt.s32.totalorder %s18_s30, %s18_s30 }
  0x1b   :  { %p469_p11 = scmp.ne.s32.totalorder %s18_s30, %s468_s12  ;;  %p474_p13 = scmp.lt.s32.totalorder %s468_s12, %s468_s12 }
  0x1d   :  { %p475_p0 = por %p474_p13, %p473_p12 }
  0x1f   :  { %p476_p1 = pnand %p475_p0, %p469_p11 }
  0x21   :  { %479 = shalt.err (!%p476_p1)
}
  0x22   :  { %s534_s1 = smov 128   ;;  %s535_s13 = smov 8  }
  0x23   :  { %23 = dma.hbm_to_vmem [thread:$0]  %s628_s0, 256, %s18_s30, [#allocation3], %s534_s1, %s534_s1, %s535_s13  }
  0x24   :  { %s536_s16 = smov [#allocation7]   ;;  %s480_s20 = scalar_lea.hbm %s630_s2, 1024 }
  0x25   :  { %s41_s17 = sshll.u32 %s536_s16, 4  ;;  %p481_p2 = scmp.ne.s32.totalorder %s630_s2, %s480_s20  ;;  %s42_s17 = int_to_ptr.vmem [resolvable:$true] %s41_s17 }
  0x26   :  { %p484_p3 = scmp.lt.u32.totalorder %s480_s20, %s630_s2 }
  0x28   :  { %p486_p4 = pnand %p484_p3, %p481_p2 }
  0x2a   :  { %489 = shalt.err (!%p486_p4)
}
  0x2b   :  { %s490_s27 = scalar_lea.vmem %s42_s17, 1024  ;;  %p495_p6 = scmp.lt.s32.totalorder %s42_s17, %s42_s17 }
  0x2c   :  { %p491_p5 = scmp.ne.s32.totalorder %s42_s17, %s490_s27  ;;  %p496_p7 = scmp.lt.s32.totalorder %s490_s27, %s490_s27 }
  0x2e   :  { %p497_p8 = por %p496_p7, %p495_p6 }
  0x30   :  { %p498_p9 = pnand %p497_p8, %p491_p5 }
  0x32   :  { %501 = shalt.err (!%p498_p9)
}
  0x33   :  { %47 = dma.hbm_to_vmem [thread:$0]  %s630_s2, 1024, %s42_s17, [#allocation6], %s531_s25, %s531_s25, %s532_s26  }
  0x34   :  { %524 = dma.done.wait [#allocation3], 256  }
  0x35   :  { %525 = vsyncadd [#allocation3], 4294967040 }
  0x36   :  { %526 = dma.done.wait [#allocation6], 2048  }
  0x37   :  { %527 = vsyncadd [#allocation6], 4294965248  ;;  %v537_v0 = vmov 0.0   ;;  %vm538_vm0 = vmmov 0   ;;  %v412_v1 = vld [vmem:[#allocation5] sm:$0xff]   ;;  %v413_v2 = vld [vmem:[#allocation5 + $0x8] sm:$0xff]  }
  0x38   :  { %362 = vmatprep.subr.bf16.mxu0 %v537_v0  ;;  %378 = vmatprep.mubr.msk.bf16.mxu0 %vm538_vm0, %v537_v0  ;;  %v414_v3 = vld [vmem:[#allocation5 + $0x10] sm:$0xff]   ;;  %v415_v4 = vld [vmem:[#allocation5 + $0x18] sm:$0xff]   ;;  %v420_v5 = vld [vmem:[#allocation7] sm:$0xff]  }
  0x39   :  { %363 = vmatpush3.bf16.msra.mxu0 %v412_v1  ;;  %v421_v6 = vld [vmem:[#allocation7 + $0x8] sm:$0xff]   ;;  %382 = vmatprep.subr.bf16.mxu1 %v420_v5  ;;  %v422_v7 = vld [vmem:[#allocation7 + $0x10] sm:$0xff]   ;;  %v416_v8 = vld [vmem:[#allocation5 + $0x20] sm:$0xff]  }
  0x3a   :  { %364 = vmatprep.subr.bf16.mxu0 %v537_v0  ;;  %383 = vmatpush3.bf16.msra.mxu1 %v420_v5  ;;  %v417_v9 = vld [vmem:[#allocation5 + $0x28] sm:$0xff]   ;;  %v418_v10 = vld [vmem:[#allocation5 + $0x30] sm:$0xff]   ;;  %v419_v11 = vld [vmem:[#allocation5 + $0x38] sm:$0xff]  }
  0x3b   :  { %384 = vmatprep.subr.bf16.mxu1 %v421_v6  ;;  %v60_v12 = vld [vmem:[#allocation2] sm:$0xff]  ;;  %v61_v13 = vld [vmem:[#allocation2 + $0x8] sm:$0xff]  ;;  %v424_v16 = vld [vmem:[#allocation7 + $0x20] sm:$0xff]  }
  0x3c   :  { %v62_v14 = vpack.c.bf16 %v61_v13, %v60_v12  ;;  %v423_v15 = vld [vmem:[#allocation7 + $0x18] sm:$0xff]   ;;  %v425_v17 = vld [vmem:[#allocation7 + $0x28] sm:$0xff]   ;;  %v426_v18 = vld [vmem:[#allocation7 + $0x30] sm:$0xff]  }
  0x3d   :  { %365 = vmatpush3.bf16.msra.mxu0 %v413_v2  ;;  %v427_v19 = vld [vmem:[#allocation7 + $0x38] sm:$0xff]   ;;  %v326_v20 = vld [vmem:[%s631_s3] ss:$0 sm:$0xff]  ;;  %s539_s3 = smov [#allocation8]  }
  0x3e   :  { %366 = vmatprep.subr.bf16.mxu0 %v537_v0  ;;  %385 = vmatpush3.bf16.msra.mxu1 %v421_v6  ;;  %s313_s26 = sshll.u32 %s539_s3, 4  ;;  %s314_s26 = int_to_ptr.vmem [resolvable:$true] %s313_s26 }
  0x3f   :  { %386 = vmatprep.subr.bf16.mxu1 %v422_v7  ;;  %s502_s29 = scalar_lea.vmem %s314_s26, 256  ;;  %p507_p11 = scmp.lt.s32.totalorder %s314_s26, %s314_s26 }
  0x40   :  { %p503_p10 = scmp.ne.s32.totalorder %s314_s26, %s502_s29  ;;  %p508_p12 = scmp.lt.s32.totalorder %s502_s29, %s502_s29 }
  0x41   :  { %367 = vmatpush3.bf16.msra.mxu0 %v414_v3 }
  0x42   :  { %368 = vmatprep.subr.bf16.mxu0 %v537_v0  ;;  %387 = vmatpush3.bf16.msra.mxu1 %v422_v7  ;;  %p509_p13 = por %p508_p12, %p507_p11 }
  0x43   :  { %388 = vmatprep.subr.bf16.mxu1 %v423_v15 }
  0x44   :  { %p510_p0 = pnand %p509_p13, %p503_p10 }
  0x45   :  { %369 = vmatpush3.bf16.msra.mxu0 %v415_v4 }
  0x46   :  { %370 = vmatprep.subr.bf16.mxu0 %v537_v0  ;;  %389 = vmatpush3.bf16.msra.mxu1 %v423_v15 }
  0x47   :  { %390 = vmatprep.subr.bf16.mxu1 %v424_v16 }
  0x49   :  { %371 = vmatpush3.bf16.msra.mxu0 %v416_v8 }
  0x4a   :  { %372 = vmatprep.subr.bf16.mxu0 %v537_v0  ;;  %391 = vmatpush3.bf16.msra.mxu1 %v424_v16 }
  0x4b   :  { %392 = vmatprep.subr.bf16.mxu1 %v425_v17 }
  0x4d   :  { %373 = vmatpush3.bf16.msra.mxu0 %v417_v9 }
  0x4e   :  { %374 = vmatprep.subr.bf16.mxu0 %v537_v0  ;;  %393 = vmatpush3.bf16.msra.mxu1 %v425_v17 }
  0x4f   :  { %394 = vmatprep.subr.bf16.mxu1 %v426_v18 }
  0x51   :  { %375 = vmatpush3.bf16.msra.mxu0 %v418_v10 }
  0x52   :  { %376 = vmatprep.subr.bf16.mxu0 %v537_v0  ;;  %395 = vmatpush3.bf16.msra.mxu1 %v426_v18 }
  0x53   :  { %396 = vmatprep.subr.bf16.mxu1 %v427_v19 }
  0x55   :  { %377 = vmatpush3.bf16.msra.mxu0 %v419_v11 }
  0x56   :  { %397 = vmatpush3.bf16.msra.mxu1 %v427_v19 }
  0x58   :  { %379 = vmatmul.mubr.bf16.vlgmr.msra.gmra.mrb[0].mxu0 %v62_v14 }
 0x12b   :  { %v168_v21 = vpop.f32.mrb[0].mxu0 }
 0x12c   :  { %v169_v22 = vadd.f32 %v326_v20, %v168_v21  ;;  %v380_v23 = vpop.f32.mrb[1].mxu0 }
 0x12d   :  { %v171_v24 = vpop.f32.mrb[2].mxu0 }
 0x12e   :  { %v172_v25 = vadd.f32 %v326_v20, %v171_v24  ;;  %v381_v26 = vpop.f32.mrb[3].mxu0  ;;  %428 = vtanh.f32 %v169_v22 }
 0x130   :  { %430 = vtanh.f32 %v172_v25 }
 0x138   :  { %v429_v27 = vpop.eup %428 }
 0x13a   :  { %v431_v28 = vpop.eup %430 }
 0x13b   :  { %v177_v29 = vpack.c.bf16 %v431_v28, %v429_v27 }
 0x13d   :  { %v178_v30 = vmul.bf16 %v177_v29, %v177_v29  ;;  %398 = vmatprep.mubr.bf16.mxu1 %v177_v29 }
 0x13f   :  { %399 = vmatmul.mubr.bf16.vlgmr.msra.gmra.mrb[0].mxu1 %v178_v30 }
 0x212   :  { %v400_v31 = vpop.f32.mrb[0].mxu1 }
 0x213   :  { %v277_v32 = vpop.f32.mrb[1].mxu1 }
 0x214   :  { %v292_v33 = vmul.f32 %v277_v32, %v277_v32  ;;  %v401_v34 = vpop.f32.mrb[2].mxu1  ;;  %v298_v43 = vsub.f32 %v429_v27, %v277_v32 }
 0x215   :  { %v280_v35 = vpop.f32.mrb[3].mxu1 }
 0x216   :  { %v294_v36 = vsub.f32 %v400_v31, %v292_v33  ;;  %v293_v37 = vmul.f32 %v280_v35, %v280_v35  ;;  %v299_v46 = vsub.f32 %v431_v28, %v280_v35 }
 0x218   :  { %v296_v38 = vmax.f32 %v294_v36, 0.0  ;;  %v295_v39 = vsub.f32 %v401_v34, %v293_v37 }
 0x21a   :  { %v300_v40 = vadd.f32 1e-05, %v296_v38  ;;  %v297_v41 = vmax.f32 %v295_v39, 0.0 }
 0x21c   :  { %432 = vrsqrt.f32 %v300_v40  ;;  %v301_v42 = vadd.f32 1e-05, %v297_v41 }
 0x21e   :  { %434 = vrsqrt.f32 %v301_v42 }
 0x226   :  { %v433_v44 = vpop.eup %432 }
 0x227   :  { %v304_v45 = vmul.f32 %v433_v44, %v298_v43 }
 0x228   :  { %v435_v47 = vpop.eup %434 }
 0x229   :  { %306 = vst [vmem:[#allocation8] sm:$0xff] %v304_v45  ;;  %v305_v48 = vmul.f32 %v435_v47, %v299_v46 }
 0x22b   :  { %307 = vst [vmem:[#allocation8 + $0x8] sm:$0xff] %v305_v48 }
 0x22c   :  { %513 = shalt.err (!%p510_p0)
}
 0x22d   :  { %s514_s6 = scalar_lea.hbm %s632_s4, 256 }
 0x22e   :  { %p515_p1 = scmp.ne.s32.totalorder %s632_s4, %s514_s6  ;;  %p518_p2 = scmp.lt.u32.totalorder %s514_s6, %s632_s4 }
 0x230   :  { %p520_p3 = pnand %p518_p2, %p515_p1 }
 0x232   :  { %523 = shalt.err (!%p520_p3)
}
 0x233   :  { %319 = dma.vmem_to_hbm [thread:$0]  %s314_s26, 256, %s632_s4, [#allocation4], %s534_s1, %s534_s1, %s535_s13  }
 0x234   :  { %528 = dma.done.wait [#allocation4], 256  }
 0x235   :  { %529 = vsyncadd [#allocation4], 4294967040 }
 0x236   :  { %323 = vsyncpa [#allocation3], 1 }
 0x237   :  { %324 = vsyncpa [#allocation6], 1 }
 0x238   :  { %325 = vsyncpa [#allocation4], 1 }

</bundles_post_ra>
